<compile_context>
chip_gen: v5e
topology: v5e:2x2
jax: 0.10.0
libtpu: 0.0.40
codegen_flags: <defaults>
</compile_context>

<pallas_src>
import functools

import jax
import jax.numpy as jnp
from jax import lax
from jax.experimental import pallas as pl
from jax.experimental.pallas import tpu as pltpu

DROPOUT_P = 0.1
LANES = 128


def _round_up(x, m):
    return (x + m - 1) // m * m


def _ner_embed_kernel(ids_ref, seed_ref, w_ref, out_ref, *, pack, v_pad,
                      drop_threshold, keep_scale, apply_dropout):
    """One grid step: gather TILE_R*PACK token embeddings + fused dropout.

    ids_ref : VMEM (TILE_R, PACK) int32       -- PACK token ids per packed row
    seed_ref: SMEM (1,) int32                 -- dropout seed
    w_ref   : VMEM (PACK*V_pad, PACK*H) f32   -- block-diagonal packed table
    out_ref : VMEM (TILE_R, PACK*H) f32       -- lane-dense output tile
    """
    tile_r = out_ref.shape[0]
    w_out = out_ref.shape[1]                 # PACK * H (lane-dense)
    k = w_ref.shape[0]                       # PACK * V_pad (contraction dim)

    # ---- vectorized gather: one-hot (TILE_R, PACK*V_pad) @ packed table (MXU) ----
    cols = lax.broadcasted_iota(jnp.int32, (tile_r, k), 1)
    one_hot = jnp.zeros((tile_r, k), dtype=jnp.float32)
    for j in range(pack):                    # pack <= 4, static unroll
        idj = ids_ref[:, j:j + 1] + j * v_pad       # (TILE_R, 1) target column
        one_hot = one_hot + (cols == idj).astype(jnp.float32)

    gathered = jnp.dot(one_hot, w_ref[...], preferred_element_type=jnp.float32)

    # ---- fused dropout: integer-threshold mask from a counter hash ----
    if apply_dropout:
        row0 = pl.program_id(0) * tile_r
        r_idx = lax.broadcasted_iota(jnp.int32, (tile_r, w_out), 0) + row0
        c_idx = lax.broadcasted_iota(jnp.int32, (tile_r, w_out), 1)
        # flat index into the row-major (N, H) output => tiling-invariant mask
        flat = r_idx * w_out + c_idx
        x = (flat + seed_ref[0] * jnp.int32(1013904223)).astype(jnp.uint32)
        # lowbias32 mixer: pure 32-bit VALU ops (xor/shift/mul), no float casts
        x = (x ^ (x >> 16)) * jnp.uint32(0x7FEB352D)
        x = (x ^ (x >> 15)) * jnp.uint32(0x846CA68B)
        x = x ^ (x >> 16)
        keep = x >= jnp.uint32(drop_threshold)
        gathered = jnp.where(keep, gathered * jnp.float32(keep_scale), 0.0)

    out_ref[...] = gathered.astype(out_ref.dtype)


def common_ner_token_embedding(batch_token_ids, embedding_table, seed,
                               dropout_p=DROPOUT_P, training=True):
    """batch_token_ids: (B, S) int32, embedding_table: (V, H) f32 -> (B, S, H) f32."""
    B, S = batch_token_ids.shape
    V, H = embedding_table.shape
    N = B * S

    # Lane packing: PACK tokens per 128-lane output row when H divides 128.
    pack = LANES // H if (H <= LANES and LANES % H == 0) else 1
    w_out = pack * H

    # Small-vocab one-hot/MXU gather path: the (padded, packed) table stays in VMEM.
    # TODO(synk): for production vocab sizes keep the table in HBM
    # (pl.BlockSpec(memory_space=pl.ANY)) and DMA-gather rows instead.
    v_pad = _round_up(V, LANES)
    if pack * v_pad * w_out * 4 > 8 * 1024 * 1024:
        raise NotImplementedError("one-hot gather path requires a small vocab")

    table_pad = jnp.zeros((v_pad, H), jnp.float32).at[:V, :].set(
        embedding_table.astype(jnp.float32))
    if pack > 1:
        # Block-diagonal: slot j maps its token to lanes [j*H, (j+1)*H).
        w_packed = jnp.kron(jnp.eye(pack, dtype=jnp.float32), table_pad)
    else:
        w_packed = table_pad

    # Token-axis tiling (~512 tokens / step), packed-row tiles multiple of 8 sublanes.
    r_raw = -(-N // pack)
    tile_r = min(max(512 // pack, 8), _round_up(r_raw, 8))
    tile_r = _round_up(tile_r, 8)
    r_total = _round_up(r_raw, tile_r)
    n_pad = r_total * pack
    grid = (r_total // tile_r,)

    flat_ids = jnp.zeros((n_pad,), jnp.int32).at[:N].set(
        batch_token_ids.reshape(N).astype(jnp.int32))
    ids2d = flat_ids.reshape(r_total, pack)
    seed_arr = jnp.asarray([seed], dtype=jnp.int32)

    apply_dropout = bool(training) and float(dropout_p) > 0.0
    drop_threshold = min(int(float(dropout_p) * 4294967296.0), 4294967295)
    keep_scale = 1.0 / (1.0 - float(dropout_p)) if apply_dropout else 1.0

    kernel = functools.partial(
        _ner_embed_kernel, pack=pack, v_pad=v_pad,
        drop_threshold=drop_threshold, keep_scale=keep_scale,
        apply_dropout=apply_dropout)

    out_packed = pl.pallas_call(
        kernel,
        out_shape=jax.ShapeDtypeStruct((r_total, w_out), jnp.float32),
        grid=grid,
        in_specs=[
            pl.BlockSpec((tile_r, pack), lambda i: (i, 0)),          # token-id tile
            pl.BlockSpec(memory_space=pltpu.SMEM),                   # seed scalar
            pl.BlockSpec((pack * v_pad, w_out), lambda i: (0, 0)),   # table (resident)
        ],
        out_specs=pl.BlockSpec((tile_r, w_out), lambda i: (i, 0)),
        compiler_params=pltpu.CompilerParams(
            dimension_semantics=("parallel",)),
    )(ids2d, seed_arr, w_packed)

    # Packed rows are row-major identical bytes of the (N, H) output.
    return out_packed.reshape(n_pad, H)[:N].reshape(B, S, H)


if __name__ == "__main__":
    # Small deterministic setup consistent with the module:
    #   vocab_size=64, hidden_size=32, batch=2, seq=8, dropout=0.1
    VOCAB, HIDDEN = 64, 32
    B, S = 2, 8

    key = jax.random.PRNGKey(0)
    k_emb, k_ids = jax.random.split(key)

    embedding_table = jax.random.normal(k_emb, (VOCAB, HIDDEN), dtype=jnp.float32)
    batch_token_ids = jax.random.randint(k_ids, (B, S), 0, VOCAB, dtype=jnp.int32)

    out = common_ner_token_embedding(batch_token_ids, embedding_table, seed=1234)
    out = jax.block_until_ready(out)
    assert out.shape == (B, S, HIDDEN) and out.dtype == jnp.float32

    # Every element is either dropped (0) or the gathered embedding scaled by 1/(1-p).
    scale = 1.0 / (1.0 - DROPOUT_P)
    gathered = embedding_table[batch_token_ids] * scale
    is_zero = jnp.abs(out) < 1e-6
    matches = jnp.abs(out - gathered) < 1e-4
    assert bool(jnp.all(is_zero | matches))

    # Keep fraction should be roughly 1 - p (deterministic given the fixed seed).
    keep_frac = float(jnp.mean((jnp.abs(out) > 1e-6).astype(jnp.float32)))
    assert 0.70 < keep_frac < 0.995, keep_frac

    # Eval mode (dropout off) reproduces the plain embedding lookup.
    out_eval = common_ner_token_embedding(
        batch_token_ids, embedding_table, seed=0, training=False)
    out_eval = jax.block_until_ready(out_eval)
    assert bool(jnp.allclose(out_eval, embedding_table[batch_token_ids],
                             atol=1e-5, rtol=1e-5))

    print("KERNEL_OK")
</pallas_src>

<mosaic_0001>
module attributes {stable_mosaic.version = 11 : i64} {
  func.func @_ner_embed_kernel(%arg0: i32, %arg1: memref<8x4xi32, #tpu.memory_space<vmem>>, %arg2: memref<1xi32, #tpu.memory_space<smem>>, %arg3: memref<512x128xf32, #tpu.memory_space<vmem>>, %arg4: memref<8x128xf32, #tpu.memory_space<vmem>>) attributes {dimension_semantics = [#tpu.dimension_semantics<parallel>], iteration_bounds = array<i64: 1>, scalar_prefetch = 0 : i64, scratch_operands = 0 : i64, tpu.core_type = #tpu.core_type<tc>, window_params = [{transform_indices = @transform_0, window_bounds = array<i64: 8, 4>}, {transform_indices = @transform_1, window_bounds = array<i64: 1>}, {pipeline_mode = #tpu.pipeline_mode<synchronous>, transform_indices = @transform_2, window_bounds = array<i64: 512, 128>}, {transform_indices = @transform_3, window_bounds = array<i64: 8, 128>}]} {
    %0 = tpu.iota {dimensions = array<i32: 1>} : vector<8x512xi32>
    %cst = arith.constant 0.000000e+00 : f32
    %1 = vector.broadcast %cst : f32 to vector<8x512xf32>
    %c0 = arith.constant 0 : index
    %c0_0 = arith.constant 0 : index
    %2 = vector.load %arg1[%c0, %c0_0] : memref<8x4xi32, #tpu.memory_space<vmem>>, vector<8x1xi32>
    %c0_i32 = arith.constant 0 : i32
    %3 = vector.broadcast %c0_i32 : i32 to vector<8x1xi32>
    %4 = arith.addi %2, %3 : vector<8x1xi32>
    %5 = vector.broadcast %4 : vector<8x1xi32> to vector<8x512xi32>
    %6 = arith.cmpi eq, %0, %5 : vector<8x512xi32>
    %7 = arith.extui %6 : vector<8x512xi1> to vector<8x512xi32>
    %8 = arith.sitofp %7 : vector<8x512xi32> to vector<8x512xf32>
    %9 = arith.addf %1, %8 : vector<8x512xf32>
    %c0_1 = arith.constant 0 : index
    %c1 = arith.constant 1 : index
    %10 = vector.load %arg1[%c0_1, %c1] : memref<8x4xi32, #tpu.memory_space<vmem>>, vector<8x1xi32>
    %c128_i32 = arith.constant 128 : i32
    %11 = vector.broadcast %c128_i32 : i32 to vector<8x1xi32>
    %12 = arith.addi %10, %11 : vector<8x1xi32>
    %13 = vector.broadcast %12 : vector<8x1xi32> to vector<8x512xi32>
    %14 = arith.cmpi eq, %0, %13 : vector<8x512xi32>
    %15 = arith.extui %14 : vector<8x512xi1> to vector<8x512xi32>
    %16 = arith.sitofp %15 : vector<8x512xi32> to vector<8x512xf32>
    %17 = arith.addf %9, %16 : vector<8x512xf32>
    %c0_2 = arith.constant 0 : index
    %c2 = arith.constant 2 : index
    %18 = vector.load %arg1[%c0_2, %c2] : memref<8x4xi32, #tpu.memory_space<vmem>>, vector<8x1xi32>
    %c256_i32 = arith.constant 256 : i32
    %19 = vector.broadcast %c256_i32 : i32 to vector<8x1xi32>
    %20 = arith.addi %18, %19 : vector<8x1xi32>
    %21 = vector.broadcast %20 : vector<8x1xi32> to vector<8x512xi32>
    %22 = arith.cmpi eq, %0, %21 : vector<8x512xi32>
    %23 = arith.extui %22 : vector<8x512xi1> to vector<8x512xi32>
    %24 = arith.sitofp %23 : vector<8x512xi32> to vector<8x512xf32>
    %25 = arith.addf %17, %24 : vector<8x512xf32>
    %c0_3 = arith.constant 0 : index
    %c3 = arith.constant 3 : index
    %26 = vector.load %arg1[%c0_3, %c3] : memref<8x4xi32, #tpu.memory_space<vmem>>, vector<8x1xi32>
    %c384_i32 = arith.constant 384 : i32
    %27 = vector.broadcast %c384_i32 : i32 to vector<8x1xi32>
    %28 = arith.addi %26, %27 : vector<8x1xi32>
    %29 = vector.broadcast %28 : vector<8x1xi32> to vector<8x512xi32>
    %30 = arith.cmpi eq, %0, %29 : vector<8x512xi32>
    %31 = arith.extui %30 : vector<8x512xi1> to vector<8x512xi32>
    %32 = arith.sitofp %31 : vector<8x512xi32> to vector<8x512xf32>
    %33 = arith.addf %25, %32 : vector<8x512xf32>
    %c0_4 = arith.constant 0 : index
    %c0_5 = arith.constant 0 : index
    %34 = vector.load %arg3[%c0_4, %c0_5] : memref<512x128xf32, #tpu.memory_space<vmem>>, vector<512x128xf32>
    %cst_6 = arith.constant dense<0.000000e+00> : vector<8x128xf32>
    %35 = tpu.matmul %33, %34, %cst_6 {dimension_numbers = #tpu.dot_dimension_numbers<[1], [0], [0], [1], [0, 0, 1, 1], [], []>} : vector<8x512xf32>, vector<512x128xf32>, vector<8x128xf32> -> vector<8x128xf32>
    %c8_i32 = arith.constant 8 : i32
    %36 = arith.muli %arg0, %c8_i32 : i32
    %37 = tpu.iota {dimensions = array<i32: 0>} : vector<8x128xi32>
    %38 = vector.broadcast %36 : i32 to vector<8x128xi32>
    %39 = arith.addi %37, %38 : vector<8x128xi32>
    %40 = tpu.iota {dimensions = array<i32: 1>} : vector<8x128xi32>
    %c128_i32_7 = arith.constant 128 : i32
    %41 = vector.broadcast %c128_i32_7 : i32 to vector<8x128xi32>
    %42 = arith.muli %39, %41 : vector<8x128xi32>
    %43 = arith.addi %42, %40 : vector<8x128xi32>
    %c0_8 = arith.constant 0 : index
    %44 = memref.load %arg2[%c0_8] : memref<1xi32, #tpu.memory_space<smem>>
    %c1013904223_i32 = arith.constant 1013904223 : i32
    %45 = arith.muli %44, %c1013904223_i32 : i32
    %46 = vector.broadcast %45 : i32 to vector<8x128xi32>
    %47 = arith.addi %43, %46 : vector<8x128xi32>
    %c16_i32 = arith.constant 16 : i32
    %48 = vector.broadcast %c16_i32 : i32 to vector<8x128xi32>
    %49 = arith.shrui %47, %48 : vector<8x128xi32>
    %50 = arith.xori %47, %49 : vector<8x128xi32>
    %c2146121005_i32 = arith.constant 2146121005 : i32
    %51 = vector.broadcast %c2146121005_i32 : i32 to vector<8x128xi32>
    %52 = arith.muli %50, %51 : vector<8x128xi32>
    %c15_i32 = arith.constant 15 : i32
    %53 = vector.broadcast %c15_i32 : i32 to vector<8x128xi32>
    %54 = arith.shrui %52, %53 : vector<8x128xi32>
    %55 = arith.xori %52, %54 : vector<8x128xi32>
    %c-2073254261_i32 = arith.constant -2073254261 : i32
    %56 = vector.broadcast %c-2073254261_i32 : i32 to vector<8x128xi32>
    %57 = arith.muli %55, %56 : vector<8x128xi32>
    %c16_i32_9 = arith.constant 16 : i32
    %58 = vector.broadcast %c16_i32_9 : i32 to vector<8x128xi32>
    %59 = arith.shrui %57, %58 : vector<8x128xi32>
    %60 = arith.xori %57, %59 : vector<8x128xi32>
    %c429496729_i32 = arith.constant 429496729 : i32
    %61 = vector.broadcast %c429496729_i32 : i32 to vector<8x128xi32>
    %62 = arith.cmpi uge, %60, %61 : vector<8x128xi32>
    %cst_10 = arith.constant 1.11111116 : f32
    %63 = vector.broadcast %cst_10 : f32 to vector<8x128xf32>
    %64 = arith.mulf %35, %63 : vector<8x128xf32>
    %cst_11 = arith.constant 0.000000e+00 : f32
    %65 = vector.broadcast %cst_11 : f32 to vector<8x128xf32>
    %66 = arith.select %62, %64, %65 : vector<8x128xi1>, vector<8x128xf32>
    %c0_12 = arith.constant 0 : index
    %c0_13 = arith.constant 0 : index
    %67 = vector.load %arg4[%c0_12, %c0_13] : memref<8x128xf32, #tpu.memory_space<vmem>>, vector<8x128xf32>
    tpu.vector_store %arg4[%c0_12, %c0_13], %66 {strides = array<i32>} : memref<8x128xf32, #tpu.memory_space<vmem>>, vector<8x128xf32>,
    return
  }
  func.func @transform_0(%arg0: i32) -> (i32, i32) {
    %c0_i32 = arith.constant 0 : i32
    %c0_i32_0 = arith.constant 0 : i32
    return %arg0, %c0_i32 : i32, i32
  }
  func.func @transform_1(%arg0: i32) -> i32 {
    %c0_i32 = arith.constant 0 : i32
    %c0_i32_0 = arith.constant 0 : i32
    return %c0_i32 : i32
  }
  func.func @transform_2(%arg0: i32) -> (i32, i32) {
    %c0_i32 = arith.constant 0 : i32
    %c0_i32_0 = arith.constant 0 : i32
    %c0_i32_1 = arith.constant 0 : i32
    return %c0_i32, %c0_i32_0 : i32, i32
  }
  func.func @transform_3(%arg0: i32) -> (i32, i32) {
    %c0_i32 = arith.constant 0 : i32
    %c0_i32_0 = arith.constant 0 : i32
    return %arg0, %c0_i32 : i32, i32
  }
}

</mosaic_0001>

<bundles_post_ra>
// kernel: tpu_custom_call.1
= control target key start
LH: loop header
LB: loop body
LE: loop exit
PB: predicated region body
PF: predicated region fallthrough
CT: control target
= control target key end

     0   :  { %9 = vsyncpa [#allocation4], 0  ;;  %s428_s0 = inlined_call_operand.vmem [shape: s32[8,4], index: 0, kind: input, shape index: {}]   ;;  %s429_s1 = inlined_call_operand.<no memory space> [shape: s32[1], index: 1, kind: input, shape index: {}]   ;;  %s430_s2 = inlined_call_operand.hbm [shape: f32[512,128], index: 2, kind: input, shape index: {}]   ;;  %s431_s3 = inlined_call_operand.hbm [shape: f32[8,128], index: 3, kind: output, shape index: {}]  }
   0x1   :  { %10 = vsyncpa [#allocation5], 0  ;;  %s19_s14 = sshll.u32 %s430_s2, 4  ;;  %s386_s15 = smov [#allocation3]   ;;  %s20_s14 = int_to_ptr.hbm [resolvable:$true] %s19_s14 }
   0x2   :  { %s21_s16 = sshll.u32 %s386_s15, 4  ;;  %s387_s17 = smov 128   ;;  %s22_s16 = int_to_ptr.vmem [resolvable:$true] %s21_s16 }
   0x3   :  { %s388_s18 = smov 8  }
   0x4   :  { %27 = dma.hbm_to_vmem [thread:$0]  %s20_s14, 8192, %s22_s16, [#allocation4], %s387_s17, %s387_s17, %s388_s18  }
   0x5   :  { %382 = dma.done.wait [#allocation4], 8192  }
   0x6   :  { %383 = vsyncadd [#allocation4], 4294959104  ;;  %v389_v0 = vmov 0   ;;  %v390_v1 = vmov 2   ;;  %v37_v2 = vld [vmem:[%s428_s0] sm:$0xff]  ;;  %v132_v3 = vld [vmem:[#allocation3 + $0x78] sm:$0xff] }
   0x7   :  { %329 = vset.pattern.permute.xlu0 %v389_v0  ;;  %331 = vset.pattern.permute.xlu1 %v390_v1  ;;  %v148_v4 = vld [vmem:[#allocation3 + $0xf8] sm:$0xff]  ;;  %v77_v5 = vadd.s32 256, %v37_v2  ;;  %v131_v8 = vld [vmem:[#allocation3 + $0x70] sm:$0xff]  ;;  %v130_v12 = vld [vmem:[#allocation3 + $0x68] sm:$0xff]  ;;  %v57_v18 = vadd.s32 128, %v37_v2  ;;  %v97_v21 = vadd.s32 384, %v37_v2 }
   0x8   :  { %39 = vperm.xlu0 %329, %v37_v2   ;;  %181 = vmatpush.msra.mxu0 %v132_v3  ;;  %v164_v6 = vld [vmem:[#allocation3 + $0x178] sm:$0xff]  ;;  %v147_v9 = vld [vmem:[#allocation3 + $0xf0] sm:$0xff]  ;;  %v146_v13 = vld [vmem:[#allocation3 + $0xe8] sm:$0xff]  ;;  %v391_v23 = vmov 1   ;;  %v392_v27 = vmov 3   ;;  %s293_s25 = sshll.u32 %s431_s3, 4  ;;  %s294_s25 = int_to_ptr.hbm [resolvable:$true] %s293_s25 }
   0x9   :  { %v180_v7 = vld [vmem:[#allocation3 + $0x1f8] sm:$0xff]  ;;  %201 = vmatpush.msra.mxu1 %v148_v4  ;;  %221 = vmatpush.msra.mxu2 %v164_v6  ;;  %v163_v10 = vld [vmem:[#allocation3 + $0x170] sm:$0xff]  ;;  %v162_v14 = vld [vmem:[#allocation3 + $0x168] sm:$0xff]  ;;  %s269_s21 = smul.u32 1013904223, %s429_s1  ;;  %s394_s1 = smov [#allocation6]  }
   0xa   :  { %v179_v11 = vld [vmem:[#allocation3 + $0x1f0] sm:$0xff]  ;;  %79 = vperm.xlu1 %331, %v77_v5   ;;  %241 = vmatpush.msra.mxu3 %v180_v7  ;;  %v178_v15 = vld [vmem:[#allocation3 + $0x1e8] sm:$0xff]  ;;  %v129_v16 = vld [vmem:[#allocation3 + $0x60] sm:$0xff]  ;;  %s291_s22 = sshll.u32 %s394_s1, 4  ;;  %s292_s22 = int_to_ptr.vmem [resolvable:$true] %s291_s22 }
   0xb   :  { %182 = vmatpush.msra.mxu0 %v131_v8  ;;  %202 = vmatpush.msra.mxu1 %v147_v9  ;;  %v145_v17 = vld [vmem:[#allocation3 + $0xe0] sm:$0xff]  ;;  %v128_v22 = vld [vmem:[#allocation3 + $0x58] sm:$0xff]  ;;  %v127_v28 = vld [vmem:[#allocation3 + $0x50] sm:$0xff]  ;;  %v32_v8 = vlaneseq }
   0xc   :  { %222 = vmatpush.msra.mxu2 %v163_v10  ;;  %242 = vmatpush.msra.mxu3 %v179_v11  ;;  %v161_v19 = vld [vmem:[#allocation3 + $0x160] sm:$0xff]  ;;  %v144_v24 = vld [vmem:[#allocation3 + $0xd8] sm:$0xff]  ;;  %v143_v29 = vld [vmem:[#allocation3 + $0xd0] sm:$0xff] }
   0xd   :  { %183 = vmatpush.msra.mxu0 %v130_v12  ;;  %203 = vmatpush.msra.mxu1 %v146_v13  ;;  %v177_v20 = vld [vmem:[#allocation3 + $0x1e0] sm:$0xff]  ;;  %v160_v25 = vld [vmem:[#allocation3 + $0x158] sm:$0xff]  ;;  %v159_v30 = vld [vmem:[#allocation3 + $0x150] sm:$0xff]  ;;  %v33_v9 = vand.u32 127, %v32_v8 }
   0xe   :  { %223 = vmatpush.msra.mxu2 %v162_v14  ;;  %243 = vmatpush.msra.mxu3 %v178_v15  ;;  %v176_v26 = vld [vmem:[#allocation3 + $0x1d8] sm:$0xff]  ;;  %v175_v31 = vld [vmem:[#allocation3 + $0x1d0] sm:$0xff]  ;;  %v126_v32 = vld [vmem:[#allocation3 + $0x48] sm:$0xff]  ;;  %v393_v15 = vmov 0.0  }
   0xf   :  { %184 = vmatpush.msra.mxu0 %v129_v16  ;;  %204 = vmatpush.msra.mxu1 %v145_v17  ;;  %v142_v33 = vld [vmem:[#allocation3 + $0xc8] sm:$0xff]  ;;  %v125_v36 = vld [vmem:[#allocation3 + $0x40] sm:$0xff]  ;;  %v124_v40 = vld [vmem:[#allocation3 + $0x38] sm:$0xff]  ;;  %v34_v11 = vadd.s32 128, %v33_v9  ;;  %v35_v12 = vadd.s32 256, %v33_v9  ;;  %v36_v13 = vadd.s32 384, %v33_v9 }
  0x10   :  { %330 = vset.pattern.permute.xlu0 %v391_v23  ;;  %224 = vmatpush.msra.mxu2 %v161_v19  ;;  %v158_v34 = vld [vmem:[#allocation3 + $0x148] sm:$0xff]  ;;  %v141_v37 = vld [vmem:[#allocation3 + $0xc0] sm:$0xff]  ;;  %v140_v41 = vld [vmem:[#allocation3 + $0xb8] sm:$0xff] }
  0x11   :  { %59 = vperm.xlu0 %330, %v57_v18   ;;  %244 = vmatpush.msra.mxu3 %v177_v20  ;;  %v174_v35 = vld [vmem:[#allocation3 + $0x1c8] sm:$0xff]  ;;  %v157_v38 = vld [vmem:[#allocation3 + $0x140] sm:$0xff]  ;;  %v156_v42 = vld [vmem:[#allocation3 + $0x138] sm:$0xff] }
  0x12   :  { %332 = vset.pattern.permute.xlu1 %v392_v27  ;;  %185 = vmatpush.msra.mxu0 %v128_v22  ;;  %v173_v39 = vld [vmem:[#allocation3 + $0x1c0] sm:$0xff]  ;;  %v172_v43 = vld [vmem:[#allocation3 + $0x1b8] sm:$0xff]  ;;  %v123_v44 = vld [vmem:[#allocation3 + $0x30] sm:$0xff] }
  0x13   :  { %99 = vperm.xlu1 %332, %v97_v21   ;;  %205 = vmatpush.msra.mxu1 %v144_v24  ;;  %v139_v45 = vld [vmem:[#allocation3 + $0xb0] sm:$0xff]  ;;  %v122_v48 = vld [vmem:[#allocation3 + $0x28] sm:$0xff]  ;;  %v121_v52 = vld [vmem:[#allocation3 + $0x20] sm:$0xff] }
  0x14   :  { %225 = vmatpush.msra.mxu2 %v160_v25  ;;  %245 = vmatpush.msra.mxu3 %v176_v26  ;;  %v155_v46 = vld [vmem:[#allocation3 + $0x130] sm:$0xff]  ;;  %v138_v49 = vld [vmem:[#allocation3 + $0xa8] sm:$0xff]  ;;  %v137_v53 = vld [vmem:[#allocation3 + $0xa0] sm:$0xff] }
  0x15   :  { %186 = vmatpush.msra.mxu0 %v127_v28  ;;  %206 = vmatpush.msra.mxu1 %v143_v29  ;;  %v171_v47 = vld [vmem:[#allocation3 + $0x1b0] sm:$0xff]  ;;  %v154_v50 = vld [vmem:[#allocation3 + $0x128] sm:$0xff]  ;;  %v153_v54 = vld [vmem:[#allocation3 + $0x120] sm:$0xff] }
  0x16   :  { %226 = vmatpush.msra.mxu2 %v159_v30  ;;  %246 = vmatpush.msra.mxu3 %v175_v31  ;;  %v170_v51 = vld [vmem:[#allocation3 + $0x1a8] sm:$0xff]  ;;  %v169_v55 = vld [vmem:[#allocation3 + $0x1a0] sm:$0xff]  ;;  %v120_v56 = vld [vmem:[#allocation3 + $0x18] sm:$0xff] }
  0x17   :  { %187 = vmatpush.msra.mxu0 %v126_v32  ;;  %207 = vmatpush.msra.mxu1 %v142_v33  ;;  %v136_v57 = vld [vmem:[#allocation3 + $0x98] sm:$0xff]  ;;  %v119_v60 = vld [vmem:[#allocation3 + $0x10] sm:$0xff]  ;;  %v118_v0 = vld [vmem:[#allocation3 + $0x8] sm:$0xff] }
  0x18   :  { %227 = vmatpush.msra.mxu2 %v158_v34  ;;  %247 = vmatpush.msra.mxu3 %v174_v35  ;;  %v152_v58 = vld [vmem:[#allocation3 + $0x118] sm:$0xff]  ;;  %v135_v61 = vld [vmem:[#allocation3 + $0x90] sm:$0xff]  ;;  %v134_v1 = vld [vmem:[#allocation3 + $0x88] sm:$0xff] }
  0x19   :  { %333 = vset.pattern.permute.xlu0 %v392_v27  ;;  %188 = vmatpush.msra.mxu0 %v125_v36  ;;  %v168_v59 = vld [vmem:[#allocation3 + $0x198] sm:$0xff]  ;;  %v151_v62 = vld [vmem:[#allocation3 + $0x110] sm:$0xff]  ;;  %v150_v2 = vld [vmem:[#allocation3 + $0x108] sm:$0xff] }
  0x1a   :  { %208 = vmatpush.msra.mxu1 %v141_v37  ;;  %228 = vmatpush.msra.mxu2 %v157_v38  ;;  %v167_v63 = vld [vmem:[#allocation3 + $0x190] sm:$0xff]  ;;  %v166_v3 = vld [vmem:[#allocation3 + $0x188] sm:$0xff]  ;;  %v117_v4 = vld [vmem:[#allocation3] sm:$0xff] }
  0x1b   :  { %248 = vmatpush.msra.mxu3 %v173_v39  ;;  %189 = vmatpush.msra.mxu0 %v124_v40  ;;  %v133_v5 = vld [vmem:[#allocation3 + $0x80] sm:$0xff] }
  0x1c   :  { %209 = vmatpush.msra.mxu1 %v140_v41  ;;  %229 = vmatpush.msra.mxu2 %v156_v42  ;;  %v149_v6 = vld [vmem:[#allocation3 + $0x100] sm:$0xff] }
  0x1d   :  { %249 = vmatpush.msra.mxu3 %v172_v43  ;;  %190 = vmatpush.msra.mxu0 %v123_v44  ;;  %v165_v7 = vld [vmem:[#allocation3 + $0x180] sm:$0xff] }
  0x1e   :  { %210 = vmatpush.msra.mxu1 %v139_v45  ;;  %230 = vmatpush.msra.mxu2 %v155_v46  ;;  %v263_v46 = vshrl.u32 %v32_v8, 7 }
  0x1f   :  { %250 = vmatpush.msra.mxu3 %v171_v47  ;;  %191 = vmatpush.msra.mxu0 %v122_v48 }
  0x20   :  { %211 = vmatpush.msra.mxu1 %v138_v49  ;;  %231 = vmatpush.msra.mxu2 %v154_v50  ;;  %v266_v47 = vmul.u32 128, %v263_v46  ;;  %v270_v49 = vstv %s269_s21 }
  0x21   :  { %251 = vmatpush.msra.mxu3 %v170_v51  ;;  %192 = vmatpush.msra.mxu0 %v121_v52 }
  0x22   :  { %212 = vmatpush.msra.mxu1 %v137_v53  ;;  %232 = vmatpush.msra.mxu2 %v153_v54  ;;  %v267_v48 = vadd.s32 %v266_v47, %v33_v9 }
  0x23   :  { %252 = vmatpush.msra.mxu3 %v169_v55  ;;  %193 = vmatpush.msra.mxu0 %v120_v56 }
  0x24   :  { %213 = vmatpush.msra.mxu1 %v136_v57  ;;  %233 = vmatpush.msra.mxu2 %v152_v58  ;;  %v271_v50 = vadd.s32 %v270_v49, %v267_v48 }
  0x25   :  { %253 = vmatpush.msra.mxu3 %v168_v59  ;;  %194 = vmatpush.msra.mxu0 %v119_v60 }
  0x26   :  { %214 = vmatpush.msra.mxu1 %v135_v61  ;;  %234 = vmatpush.msra.mxu2 %v151_v62  ;;  %v272_v51 = vshrl.u32 %v271_v50, 16 }
  0x27   :  { %254 = vmatpush.msra.mxu3 %v167_v63  ;;  %195 = vmatpush.msra.mxu0 %v118_v0 }
  0x28   :  { %215 = vmatpush.msra.mxu1 %v134_v1  ;;  %235 = vmatpush.msra.mxu2 %v150_v2  ;;  %v273_v52 = vxor.u32 %v272_v51, %v271_v50 }
  0x29   :  { %255 = vmatpush.msra.mxu3 %v166_v3  ;;  %196 = vmatpush.msra.mxu0 %v117_v4 }
  0x2a   :  { %216 = vmatpush.msra.mxu1 %v133_v5  ;;  %236 = vmatpush.msra.mxu2 %v149_v6  ;;  %v274_v53 = vmul.u32 2146121005, %v273_v52 }
  0x2b   :  { %256 = vmatpush.msra.mxu3 %v165_v7 }
  0x2c   :  { %v275_v54 = vshrl.u32 %v274_v53, 15 }
  0x2e   :  { %v276_v55 = vxor.u32 %v275_v54, %v274_v53 }
  0x30   :  { %v277_v56 = vmul.u32 2221713035, %v276_v55 }
  0x32   :  { %v278_v57 = vshrl.u32 %v277_v56, 16 }
  0x34   :  { %v279_v60 = vxor.u32 %v278_v57, %v277_v56 }
  0x36   :  { %v319_v63 = vxor.u32 2147483648, %v279_v60 }
  0x7a   :  { %v40_v10 = vpop.permute.xlu0 %39 }
  0x7b   :  { %vm41_vm0 = vcmp.eq.s32.totalorder %v33_v9, %v40_v10  ;;  %vm42_vm1 = vcmp.eq.s32.totalorder %v34_v11, %v40_v10  ;;  %vm43_vm2 = vcmp.eq.s32.totalorder %v35_v12, %v40_v10  ;;  %vm44_vm3 = vcmp.eq.s32.totalorder %v36_v13, %v40_v10 }
  0x7c   :  { %v80_v14 = vpop.permute.xlu1 %79  ;;  %v303_v16 = vsel %vm41_vm0, 1.0, %v393_v15  ;;  %v304_v17 = vsel %vm42_vm1, 1.0, %v393_v15  ;;  %v305_v18 = vsel %vm43_vm2, 1.0, %v393_v15  ;;  %v306_v19 = vsel %vm44_vm3, 1.0, %v393_v15 }
  0x7d   :  { %vm81_vm4 = vcmp.eq.s32.totalorder %v33_v9, %v80_v14  ;;  %vm82_vm5 = vcmp.eq.s32.totalorder %v34_v11, %v80_v14  ;;  %vm83_vm6 = vcmp.eq.s32.totalorder %v35_v12, %v80_v14  ;;  %vm84_vm7 = vcmp.eq.s32.totalorder %v36_v13, %v80_v14 }
  0x7e   :  { %v311_v21 = vsel %vm81_vm4, 1.0, %v393_v15  ;;  %v312_v22 = vsel %vm82_vm5, 1.0, %v393_v15  ;;  %v313_v23 = vsel %vm83_vm6, 1.0, %v393_v15  ;;  %v314_v39 = vsel %vm84_vm7, 1.0, %v393_v15 }
  0x7f   :  { %vm282_vm0 = vcmp.ge.s32.totalorder %v319_v63, 2576980377 }
  0x83   :  { %v60_v20 = vpop.permute.xlu0 %59 }
  0x84   :  { %vm61_vm8 = vcmp.eq.s32.totalorder %v33_v9, %v60_v20  ;;  %vm62_vm9 = vcmp.eq.s32.totalorder %v34_v11, %v60_v20  ;;  %vm63_vm10 = vcmp.eq.s32.totalorder %v35_v12, %v60_v20  ;;  %vm64_vm11 = vcmp.eq.s32.totalorder %v36_v13, %v60_v20 }
  0x85   :  { %v307_v24 = vsel %vm61_vm8, 1.0, %v393_v15  ;;  %v308_v25 = vsel %vm62_vm9, 1.0, %v393_v15  ;;  %v309_v26 = vsel %vm63_vm10, 1.0, %v393_v15  ;;  %v310_v27 = vsel %vm64_vm11, 1.0, %v393_v15  ;;  %v100_v28 = vpop.permute.xlu1 %99 }
  0x86   :  { %v73_v29 = vadd.f32 %v307_v24, %v303_v16  ;;  %vm101_vm12 = vcmp.eq.s32.totalorder %v33_v9, %v100_v28  ;;  %v74_v30 = vadd.f32 %v308_v25, %v304_v17  ;;  %vm102_vm13 = vcmp.eq.s32.totalorder %v34_v11, %v100_v28 }
  0x87   :  { %v315_v31 = vsel %vm101_vm12, 1.0, %v393_v15  ;;  %v316_v32 = vsel %vm102_vm13, 1.0, %v393_v15  ;;  %v75_v33 = vadd.f32 %v309_v26, %v305_v18  ;;  %vm103_vm14 = vcmp.eq.s32.totalorder %v35_v12, %v100_v28 }
  0x88   :  { %v93_v34 = vadd.f32 %v311_v21, %v73_v29  ;;  %v94_v35 = vadd.f32 %v312_v22, %v74_v30  ;;  %v317_v36 = vsel %vm103_vm14, 1.0, %v393_v15  ;;  %v76_v37 = vadd.f32 %v310_v27, %v306_v19 }
  0x89   :  { %v95_v38 = vadd.f32 %v313_v23, %v75_v33  ;;  %vm104_vm15 = vcmp.eq.s32.totalorder %v36_v13, %v100_v28 }
  0x8a   :  { %v113_v40 = vadd.f32 %v315_v31, %v93_v34  ;;  %v114_v41 = vadd.f32 %v316_v32, %v94_v35  ;;  %v96_v42 = vadd.f32 %v314_v39, %v76_v37  ;;  %v318_v43 = vsel %vm104_vm15, 1.0, %v393_v15 }
  0x8b   :  { %v115_v44 = vadd.f32 %v317_v36, %v95_v38 }
  0x8c   :  { %197 = vmatmul.f32.vlgmr.msra.gmra.mxu0 %v113_v40  ;;  %217 = vmatmul.f32.vlgmr.msra.gmra.mxu1 %v114_v41  ;;  %v116_v45 = vadd.f32 %v318_v43, %v96_v42 }
  0x8d   :  { %237 = vmatmul.f32.vlgmr.msra.gmra.mxu2 %v115_v44 }
  0x8e   :  { %257 = vmatmul.f32.vlgmr.msra.gmra.mxu3 %v116_v45 }
 0x109   :  { %v198_v58 = vpop.f32.mrf.mxu0  ;;  %v218_v59 = vpop.f32.mrf.mxu1 }
 0x10a   :  { %v219_v61 = vadd.f32 %v218_v59, %v198_v58 }
 0x110   :  { %v238_v62 = vpop.f32.mrf.mxu2 }
 0x111   :  { %v239_v0 = vadd.f32 %v238_v62, %v219_v61  ;;  %v258_v1 = vpop.f32.mrf.mxu3 }
 0x113   :  { %v259_v2 = vadd.f32 %v258_v1, %v239_v0 }
 0x115   :  { %v283_v3 = vmul.f32 1.1111112, %v259_v2 }
 0x117   :  { %v284_v4 = vsel %vm282_vm0, %v283_v3, 0.0 }
 0x118   :  { %285 = vst [vmem:[#allocation6] sm:$0xff] %v284_v4 }
 0x119   :  { %296 = dma.vmem_to_hbm [thread:$0]  %s292_s22, 128, %s294_s25, [#allocation5]  }
 0x11a   :  { %384 = dma.done.wait [#allocation5], 128  }
 0x11b   :  { %385 = vsyncadd [#allocation5], 4294967168 }
 0x11c   :  { %301 = vsyncpa [#allocation4], 1 }
 0x11d   :  { %302 = vsyncpa [#allocation5], 1 }

</bundles_post_ra>
